<compile_context>
chip_gen: v5e
topology: v5e:2x2
jax: 0.10.0
libtpu: 0.0.40
codegen_flags: <defaults>
</compile_context>

<pallas_src>
import jax
import jax.numpy as jnp
from jax.experimental import pallas as pl
from jax.experimental.pallas import tpu as pltpu

IN_DIM = 784          # Flatten of (1, 28, 28)
HID = 256
OUT_PAD = 128         # real output width is 1; padded lane-dense (unmasked vst)
NEG_SLOPE = 0.01      # PyTorch nn.LeakyReLU default
TM_MAX = 512          # batch-row tile cap (>=2 grid steps whenever N > 512)


def _round_up(x, m):
    return (x + m - 1) // m * m


# ----------------------------------------------------------------------------
# Fused 3-layer MLP kernel: all weights resident in VMEM, bf16 MXU, f32 acc.
# ----------------------------------------------------------------------------
def _disc_kernel(x_ref, w1_ref, b1_ref, w2_ref, b2_ref, w3_ref, b3_ref, o_ref):
    # Cast the f32 activation tile to bf16 once, in-kernel (no wrapper copy).
    x = x_ref[...].astype(jnp.bfloat16)
    # Linear(784->256) + LeakyReLU
    h = jnp.dot(x, w1_ref[...], preferred_element_type=jnp.float32)
    h = h + b1_ref[...]
    h = jnp.maximum(h, NEG_SLOPE * h)
    # Linear(256->256) + LeakyReLU
    h = jnp.dot(h.astype(jnp.bfloat16), w2_ref[...],
                preferred_element_type=jnp.float32)
    h = h + b2_ref[...]
    h = jnp.maximum(h, NEG_SLOPE * h)
    # Linear(256->1), output packed into 128 lanes (cols 1..127 stay zero)
    out = jnp.dot(h.astype(jnp.bfloat16), w3_ref[...],
                  preferred_element_type=jnp.float32)
    out = out + b3_ref[...]
    o_ref[...] = out.astype(o_ref.dtype)


def discriminator_forward(x, params):
    """x: (N, C, H, W) with C*H*W == 784 (or already (N, 784)). Returns (N, 1) f32."""
    N = x.shape[0]
    x2 = x.reshape(N, -1)                                    # Flatten
    assert x2.shape[1] == IN_DIM, x2.shape

    tm = min(_round_up(N, 8), TM_MAX)
    Np = _round_up(N, tm)
    if Np != N:                                              # row pad only if needed
        x2 = jnp.pad(x2, ((0, Np - N), (0, 0)))

    out = pl.pallas_call(
        _disc_kernel,
        out_shape=jax.ShapeDtypeStruct((Np, OUT_PAD), jnp.bfloat16),
        grid_spec=pltpu.PrefetchScalarGridSpec(
            num_scalar_prefetch=0,
            grid=(Np // tm,),
            in_specs=[
                pl.BlockSpec((tm, IN_DIM), lambda i: (i, 0)),     # x tile (f32)
                pl.BlockSpec((IN_DIM, HID), lambda i: (0, 0)),    # w1 (784,256) bf16
                pl.BlockSpec((1, HID), lambda i: (0, 0)),         # b1
                pl.BlockSpec((HID, HID), lambda i: (0, 0)),       # w2
                pl.BlockSpec((1, HID), lambda i: (0, 0)),         # b2
                pl.BlockSpec((HID, OUT_PAD), lambda i: (0, 0)),   # w3 (padded)
                pl.BlockSpec((1, OUT_PAD), lambda i: (0, 0)),     # b3 (padded)
            ],
            out_specs=pl.BlockSpec((tm, OUT_PAD), lambda i: (i, 0)),
        ),
        compiler_params=pltpu.CompilerParams(
            dimension_semantics=("parallel",)),
    )(x2, params["w1"], params["b1"], params["w2"], params["b2"],
      params["w3"], params["b3"])
    return out[:N, :1].astype(jnp.float32)


# ----------------------------------------------------------------------------
# Parameters: PyTorch-shaped init, then one-time prep (transpose/pad/bf16 cast)
# ----------------------------------------------------------------------------
def init_raw_params(key):
    ks = jax.random.split(key, 6)
    s = 0.05
    return {
        "w1": jax.random.normal(ks[0], (256, 784), jnp.float32) * s,  # (out, in)
        "b1": jax.random.normal(ks[1], (256,), jnp.float32) * s,
        "w2": jax.random.normal(ks[2], (256, 256), jnp.float32) * s,
        "b2": jax.random.normal(ks[3], (256,), jnp.float32) * s,
        "w3": jax.random.normal(ks[4], (1, 256), jnp.float32) * s,
        "b3": jax.random.normal(ks[5], (1,), jnp.float32) * s,
    }


def prepare_params(raw):
    """Hoisted preprocessing: transpose to (in, out), pad only the 1-wide output
    column to a lane-dense 128, cast weights to bf16 once. Biases stay f32."""
    w1 = raw["w1"].T.astype(jnp.bfloat16)                                 # (784, 256)
    w2 = raw["w2"].T.astype(jnp.bfloat16)                                 # (256, 256)
    w3 = jnp.pad(raw["w3"].T, ((0, 0), (0, OUT_PAD - 1))).astype(jnp.bfloat16)
    b1 = raw["b1"].reshape(1, HID).astype(jnp.float32)
    b2 = raw["b2"].reshape(1, HID).astype(jnp.float32)
    b3 = jnp.pad(raw["b3"], (0, OUT_PAD - 1)).reshape(1, OUT_PAD).astype(jnp.float32)
    return {"w1": w1, "b1": b1, "w2": w2, "b2": b2, "w3": w3, "b3": b3}


def reference_forward(x, raw):
    """Plain-JAX reference with the same bf16-operand / f32-accumulate math."""
    N = x.shape[0]
    h = x.reshape(N, -1)

    def lin(h, w, b):
        return jnp.dot(h.astype(jnp.bfloat16), w.T.astype(jnp.bfloat16),
                       preferred_element_type=jnp.float32) + b

    h = lin(h, raw["w1"], raw["b1"]); h = jnp.maximum(h, NEG_SLOPE * h)
    h = lin(h, raw["w2"], raw["b2"]); h = jnp.maximum(h, NEG_SLOPE * h)
    return lin(h, raw["w3"], raw["b3"])


if __name__ == "__main__":
    key = jax.random.PRNGKey(0)
    k_param, k_x = jax.random.split(key)
    raw = init_raw_params(k_param)
    params = prepare_params(raw)      # one-time weight prep (not per forward)

    batch = 8
    x = jax.random.normal(k_x, (batch, 1, 28, 28), jnp.float32)

    fwd = jax.jit(discriminator_forward)
    out = jax.block_until_ready(fwd(x, params))

    assert out.shape == (batch, 1), out.shape
    assert bool(jnp.all(jnp.isfinite(out)))

    ref = reference_forward(x, raw)
    assert bool(jnp.allclose(out, ref, rtol=2e-2, atol=2e-2)), (
        float(jnp.max(jnp.abs(out - ref))))
    print("KERNEL_OK")
</pallas_src>

<mosaic_0001>
module attributes {stable_mosaic.version = 11 : i64} {
  func.func @_disc_kernel(%arg0: i32, %arg1: memref<8x784xf32, #tpu.memory_space<vmem>>, %arg2: memref<784x256xbf16, #tpu.memory_space<vmem>>, %arg3: memref<1x256xf32, #tpu.memory_space<vmem>>, %arg4: memref<256x256xbf16, #tpu.memory_space<vmem>>, %arg5: memref<1x256xf32, #tpu.memory_space<vmem>>, %arg6: memref<256x128xbf16, #tpu.memory_space<vmem>>, %arg7: memref<1x128xf32, #tpu.memory_space<vmem>>, %arg8: memref<8x128xbf16, #tpu.memory_space<vmem>>) attributes {dimension_semantics = [#tpu.dimension_semantics<parallel>], iteration_bounds = array<i64: 1>, scalar_prefetch = 0 : i64, scratch_operands = 0 : i64, tpu.core_type = #tpu.core_type<tc>, window_params = [{transform_indices = @transform_0, window_bounds = array<i64: 8, 784>}, {pipeline_mode = #tpu.pipeline_mode<synchronous>, transform_indices = @transform_1, window_bounds = array<i64: 784, 256>}, {pipeline_mode = #tpu.pipeline_mode<synchronous>, transform_indices = @transform_2, window_bounds = array<i64: 1, 256>}, {pipeline_mode = #tpu.pipeline_mode<synchronous>, transform_indices = @transform_3, window_bounds = array<i64: 256, 256>}, {pipeline_mode = #tpu.pipeline_mode<synchronous>, transform_indices = @transform_4, window_bounds = array<i64: 1, 256>}, {pipeline_mode = #tpu.pipeline_mode<synchronous>, transform_indices = @transform_5, window_bounds = array<i64: 256, 128>}, {pipeline_mode = #tpu.pipeline_mode<synchronous>, transform_indices = @transform_6, window_bounds = array<i64: 1, 128>}, {transform_indices = @transform_7, window_bounds = array<i64: 8, 128>}]} {
    %c0 = arith.constant 0 : index
    %c0_0 = arith.constant 0 : index
    %0 = vector.load %arg1[%c0, %c0_0] : memref<8x784xf32, #tpu.memory_space<vmem>>, vector<8x784xf32>
    %1 = arith.truncf %0 : vector<8x784xf32> to vector<8x784xbf16>
    %c0_1 = arith.constant 0 : index
    %c0_2 = arith.constant 0 : index
    %2 = vector.load %arg2[%c0_1, %c0_2] : memref<784x256xbf16, #tpu.memory_space<vmem>>, vector<784x256xbf16>
    %cst = arith.constant dense<0.000000e+00> : vector<8x256xf32>
    %3 = tpu.matmul %1, %2, %cst {dimension_numbers = #tpu.dot_dimension_numbers<[1], [0], [0], [1], [0, 0, 1, 1], [], []>} : vector<8x784xbf16>, vector<784x256xbf16>, vector<8x256xf32> -> vector<8x256xf32>
    %c0_3 = arith.constant 0 : index
    %c0_4 = arith.constant 0 : index
    %4 = vector.load %arg3[%c0_3, %c0_4] : memref<1x256xf32, #tpu.memory_space<vmem>>, vector<1x256xf32>
    %5 = vector.broadcast %4 : vector<1x256xf32> to vector<8x256xf32>
    %6 = arith.addf %3, %5 : vector<8x256xf32>
    %cst_5 = arith.constant 0.00999999977 : f32
    %7 = vector.broadcast %cst_5 : f32 to vector<8x256xf32>
    %8 = arith.mulf %7, %6 : vector<8x256xf32>
    %9 = arith.maximumf %6, %8 : vector<8x256xf32>
    %10 = arith.truncf %9 : vector<8x256xf32> to vector<8x256xbf16>
    %c0_6 = arith.constant 0 : index
    %c0_7 = arith.constant 0 : index
    %11 = vector.load %arg4[%c0_6, %c0_7] : memref<256x256xbf16, #tpu.memory_space<vmem>>, vector<256x256xbf16>
    %cst_8 = arith.constant dense<0.000000e+00> : vector<8x256xf32>
    %12 = tpu.matmul %10, %11, %cst_8 {dimension_numbers = #tpu.dot_dimension_numbers<[1], [0], [0], [1], [0, 0, 1, 1], [], []>} : vector<8x256xbf16>, vector<256x256xbf16>, vector<8x256xf32> -> vector<8x256xf32>
    %c0_9 = arith.constant 0 : index
    %c0_10 = arith.constant 0 : index
    %13 = vector.load %arg5[%c0_9, %c0_10] : memref<1x256xf32, #tpu.memory_space<vmem>>, vector<1x256xf32>
    %14 = vector.broadcast %13 : vector<1x256xf32> to vector<8x256xf32>
    %15 = arith.addf %12, %14 : vector<8x256xf32>
    %cst_11 = arith.constant 0.00999999977 : f32
    %16 = vector.broadcast %cst_11 : f32 to vector<8x256xf32>
    %17 = arith.mulf %16, %15 : vector<8x256xf32>
    %18 = arith.maximumf %15, %17 : vector<8x256xf32>
    %19 = arith.truncf %18 : vector<8x256xf32> to vector<8x256xbf16>
    %c0_12 = arith.constant 0 : index
    %c0_13 = arith.constant 0 : index
    %20 = vector.load %arg6[%c0_12, %c0_13] : memref<256x128xbf16, #tpu.memory_space<vmem>>, vector<256x128xbf16>
    %cst_14 = arith.constant dense<0.000000e+00> : vector<8x128xf32>
    %21 = tpu.matmul %19, %20, %cst_14 {dimension_numbers = #tpu.dot_dimension_numbers<[1], [0], [0], [1], [0, 0, 1, 1], [], []>} : vector<8x256xbf16>, vector<256x128xbf16>, vector<8x128xf32> -> vector<8x128xf32>
    %c0_15 = arith.constant 0 : index
    %c0_16 = arith.constant 0 : index
    %22 = vector.load %arg7[%c0_15, %c0_16] : memref<1x128xf32, #tpu.memory_space<vmem>>, vector<1x128xf32>
    %23 = vector.broadcast %22 : vector<1x128xf32> to vector<8x128xf32>
    %24 = arith.addf %21, %23 : vector<8x128xf32>
    %25 = arith.truncf %24 : vector<8x128xf32> to vector<8x128xbf16>
    %c0_17 = arith.constant 0 : index
    %c0_18 = arith.constant 0 : index
    %26 = vector.load %arg8[%c0_17, %c0_18] : memref<8x128xbf16, #tpu.memory_space<vmem>>, vector<8x128xbf16>
    tpu.vector_store %arg8[%c0_17, %c0_18], %25 {strides = array<i32>} : memref<8x128xbf16, #tpu.memory_space<vmem>>, vector<8x128xbf16>,
    return
  }
  func.func @transform_0(%arg0: i32) -> (i32, i32) {
    %c0_i32 = arith.constant 0 : i32
    %c0_i32_0 = arith.constant 0 : i32
    return %arg0, %c0_i32 : i32, i32
  }
  func.func @transform_1(%arg0: i32) -> (i32, i32) {
    %c0_i32 = arith.constant 0 : i32
    %c0_i32_0 = arith.constant 0 : i32
    %c0_i32_1 = arith.constant 0 : i32
    return %c0_i32, %c0_i32_0 : i32, i32
  }
  func.func @transform_2(%arg0: i32) -> (i32, i32) {
    %c0_i32 = arith.constant 0 : i32
    %c0_i32_0 = arith.constant 0 : i32
    %c0_i32_1 = arith.constant 0 : i32
    return %c0_i32, %c0_i32_0 : i32, i32
  }
  func.func @transform_3(%arg0: i32) -> (i32, i32) {
    %c0_i32 = arith.constant 0 : i32
    %c0_i32_0 = arith.constant 0 : i32
    %c0_i32_1 = arith.constant 0 : i32
    return %c0_i32, %c0_i32_0 : i32, i32
  }
  func.func @transform_4(%arg0: i32) -> (i32, i32) {
    %c0_i32 = arith.constant 0 : i32
    %c0_i32_0 = arith.constant 0 : i32
    %c0_i32_1 = arith.constant 0 : i32
    return %c0_i32, %c0_i32_0 : i32, i32
  }
  func.func @transform_5(%arg0: i32) -> (i32, i32) {
    %c0_i32 = arith.constant 0 : i32
    %c0_i32_0 = arith.constant 0 : i32
    %c0_i32_1 = arith.constant 0 : i32
    return %c0_i32, %c0_i32_0 : i32, i32
  }
  func.func @transform_6(%arg0: i32) -> (i32, i32) {
    %c0_i32 = arith.constant 0 : i32
    %c0_i32_0 = arith.constant 0 : i32
    %c0_i32_1 = arith.constant 0 : i32
    return %c0_i32, %c0_i32_0 : i32, i32
  }
  func.func @transform_7(%arg0: i32) -> (i32, i32) {
    %c0_i32 = arith.constant 0 : i32
    %c0_i32_0 = arith.constant 0 : i32
    return %arg0, %c0_i32 : i32, i32
  }
}

</mosaic_0001>

<bundles_post_ra>
// kernel: discriminator_forward.1
= control target key start
LH: loop header
LB: loop body
LE: loop exit
PB: predicated region body
PF: predicated region fallthrough
CT: control target
= control target key end

     0   :  { %12 = vsyncpa [#allocation3], 0  ;;  %s2779_s0 = inlined_call_operand.vmem [shape: f32[8,784], index: 0, kind: input, shape index: {}]   ;;  %s2780_s1 = inlined_call_operand.vmem [shape: bf16[784,256], index: 1, kind: input, shape index: {}]   ;;  %s2781_s2 = inlined_call_operand.vmem [shape: f32[1,256], index: 2, kind: input, shape index: {}]   ;;  %s2782_s3 = inlined_call_operand.hbm [shape: bf16[256,256], index: 3, kind: input, shape index: {}]   ;;  %s2783_s4 = inlined_call_operand.vmem [shape: f32[1,256], index: 4, kind: input, shape index: {}]   ;;  %s2784_s5 = inlined_call_operand.hbm [shape: bf16[256,128], index: 5, kind: input, shape index: {}]   ;;  %s2785_s6 = inlined_call_operand.vmem [shape: f32[1,128], index: 6, kind: input, shape index: {}]   ;;  %s2786_s7 = inlined_call_operand.vmem [shape: bf16[8,128], index: 7, kind: output, shape index: {}]  }
   0x1   :  { %s24_s26 = sshll.u32 %s2782_s3, 4  ;;  %s25_s26 = int_to_ptr.hbm [resolvable:$true] %s24_s26 }
   0x2   :  { %13 = vsyncpa [#allocation5], 0  ;;  %s2072_s27 = smov [#allocation2]   ;;  %s39_s8 = sshll.u32 %s2784_s5, 4  ;;  %s40_s8 = int_to_ptr.hbm [resolvable:$true] %s39_s8 }
   0x3   :  { %s26_s28 = sshll.u32 %s2072_s27, 4  ;;  %s2073_s9 = smov 128   ;;  %s27_s28 = int_to_ptr.vmem [resolvable:$true] %s26_s28 }
   0x4   :  { %s2074_s10 = smov 8   ;;  %s2075_s11 = smov [#allocation4]  }
   0x5   :  { %32 = dma.hbm_to_vmem [thread:$0]  %s25_s26, 4096, %s27_s28, [#allocation3], %s2073_s9, %s2073_s9, %s2074_s10  }
   0x6   :  { %s41_s12 = sshll.u32 %s2075_s11, 4  ;;  %s2076_s13 = smov 64   ;;  %s42_s12 = int_to_ptr.vmem [resolvable:$true] %s41_s12 }
   0x7   :  { %s2077_s14 = smov 4  }
   0x8   :  { %47 = dma.hbm_to_vmem [thread:$0]  %s40_s8, 2048, %s42_s12, [#allocation5], %s2076_s13, %s2076_s13, %s2077_s14  }
   0x9   :  { %2068 = dma.done.wait [#allocation3], 4096  }
   0xa   :  { %2069 = vsyncadd [#allocation3], 4294963200 }
   0xb   :  { %2070 = dma.done.wait [#allocation5], 2048  }
   0xc   :  { %2071 = vsyncadd [#allocation5], 4294965248  ;;  %v1339_v0 = vld [vmem:[%s2780_s1 + $0x70] sm:$0xf]  ;;  %v1882_v1 = vld [vmem:[%s2780_s1 + $0x74] sm:$0xf0] }
   0xd   :  { %v1467_v2 = vld [vmem:[%s2780_s1 + $0x170] sm:$0xf]  ;;  %v1340_v3 = vor.u32 %v1882_v1, %v1339_v0  ;;  %v1914_v4 = vld [vmem:[%s2780_s1 + $0x174] sm:$0xf0]  ;;  %v1331_v11 = vld [vmem:[%s2780_s1 + $0x60] sm:$0xf] }
   0xe   :  { %v1531_v5 = vld [vmem:[%s2780_s1 + $0x1f0] sm:$0xf]  ;;  %v1930_v6 = vld [vmem:[%s2780_s1 + $0x1f4] sm:$0xf0]  ;;  %v1468_v7 = vor.u32 %v1914_v4, %v1467_v2  ;;  %v1880_v13 = vld [vmem:[%s2780_s1 + $0x64] sm:$0xf0] }
   0xf   :  { %v1532_v8 = vor.u32 %v1930_v6, %v1531_v5  ;;  %v1403_v9 = vld [vmem:[%s2780_s1 + $0xf0] sm:$0xf]  ;;  %v1898_v10 = vld [vmem:[%s2780_s1 + $0xf4] sm:$0xf0]  ;;  %671 = vmatpush.bf16.msra.mxu0 %v1340_v3  ;;  %v1459_v14 = vld [vmem:[%s2780_s1 + $0x160] sm:$0xf]  ;;  %v1332_v16 = vor.u32 %v1880_v13, %v1331_v11 }
  0x10   :  { %v1404_v12 = vor.u32 %v1898_v10, %v1403_v9  ;;  %v1912_v15 = vld [vmem:[%s2780_s1 + $0x164] sm:$0xf0]  ;;  %697 = vmatpush.bf16.msra.mxu2 %v1468_v7  ;;  %v1523_v18 = vld [vmem:[%s2780_s1 + $0x1e0] sm:$0xf]  ;;  %v1323_v23 = vld [vmem:[%s2780_s1 + $0x50] sm:$0xf] }
  0x11   :  { %710 = vmatpush.bf16.msra.mxu3 %v1532_v8  ;;  %v1460_v17 = vor.u32 %v1912_v15, %v1459_v14  ;;  %v1928_v19 = vld [vmem:[%s2780_s1 + $0x1e4] sm:$0xf0]  ;;  %v1395_v20 = vld [vmem:[%s2780_s1 + $0xe0] sm:$0xf]  ;;  %v1878_v24 = vld [vmem:[%s2780_s1 + $0x54] sm:$0xf0] }
  0x12   :  { %684 = vmatpush.bf16.msra.mxu1 %v1404_v12  ;;  %v1524_v21 = vor.u32 %v1928_v19, %v1523_v18  ;;  %v1896_v22 = vld [vmem:[%s2780_s1 + $0xe4] sm:$0xf0]  ;;  %v1451_v26 = vld [vmem:[%s2780_s1 + $0x150] sm:$0xf]  ;;  %v1910_v27 = vld [vmem:[%s2780_s1 + $0x154] sm:$0xf0]  ;;  %v1324_v29 = vor.u32 %v1878_v24, %v1323_v23 }
  0x13   :  { %v1396_v25 = vor.u32 %v1896_v22, %v1395_v20  ;;  %v1515_v28 = vld [vmem:[%s2780_s1 + $0x1d0] sm:$0xf]  ;;  %672 = vmatpush.bf16.msra.mxu0 %v1332_v16  ;;  %v1926_v30 = vld [vmem:[%s2780_s1 + $0x1d4] sm:$0xf0]  ;;  %v1452_v33 = vor.u32 %v1910_v27, %v1451_v26  ;;  %v1315_v35 = vld [vmem:[%s2780_s1 + $0x40] sm:$0xf] }
  0x14   :  { %v1387_v31 = vld [vmem:[%s2780_s1 + $0xd0] sm:$0xf]  ;;  %v1894_v32 = vld [vmem:[%s2780_s1 + $0xd4] sm:$0xf0]  ;;  %698 = vmatpush.bf16.msra.mxu2 %v1460_v17  ;;  %v1516_v34 = vor.u32 %v1926_v30, %v1515_v28  ;;  %v1876_v36 = vld [vmem:[%s2780_s1 + $0x44] sm:$0xf0] }
  0x15   :  { %711 = vmatpush.bf16.msra.mxu3 %v1524_v21  ;;  %v1443_v37 = vld [vmem:[%s2780_s1 + $0x140] sm:$0xf]  ;;  %v1388_v38 = vor.u32 %v1894_v32, %v1387_v31  ;;  %v1908_v39 = vld [vmem:[%s2780_s1 + $0x144] sm:$0xf0]  ;;  %v1316_v44 = vor.u32 %v1876_v36, %v1315_v35  ;;  %v1307_v47 = vld [vmem:[%s2780_s1 + $0x30] sm:$0xf] }
  0x16   :  { %685 = vmatpush.bf16.msra.mxu1 %v1396_v25  ;;  %v1507_v40 = vld [vmem:[%s2780_s1 + $0x1c0] sm:$0xf]  ;;  %v1924_v41 = vld [vmem:[%s2780_s1 + $0x1c4] sm:$0xf0]  ;;  %v1444_v45 = vor.u32 %v1908_v39, %v1443_v37  ;;  %v1874_v48 = vld [vmem:[%s2780_s1 + $0x34] sm:$0xf0] }
  0x17   :  { %v1379_v42 = vld [vmem:[%s2780_s1 + $0xc0] sm:$0xf]  ;;  %v1892_v43 = vld [vmem:[%s2780_s1 + $0xc4] sm:$0xf0]  ;;  %673 = vmatpush.bf16.msra.mxu0 %v1324_v29  ;;  %v1508_v46 = vor.u32 %v1924_v41, %v1507_v40  ;;  %v1435_v49 = vld [vmem:[%s2780_s1 + $0x130] sm:$0xf]  ;;  %v1308_v56 = vor.u32 %v1874_v48, %v1307_v47 }
  0x18   :  { %699 = vmatpush.bf16.msra.mxu2 %v1452_v33  ;;  %v1380_v50 = vor.u32 %v1892_v43, %v1379_v42  ;;  %v1906_v51 = vld [vmem:[%s2780_s1 + $0x134] sm:$0xf0]  ;;  %v1499_v52 = vld [vmem:[%s2780_s1 + $0x1b0] sm:$0xf]  ;;  %v1299_v59 = vld [vmem:[%s2780_s1 + $0x20] sm:$0xf] }
  0x19   :  { %712 = vmatpush.bf16.msra.mxu3 %v1516_v34  ;;  %v1922_v53 = vld [vmem:[%s2780_s1 + $0x1b4] sm:$0xf0]  ;;  %v1371_v54 = vld [vmem:[%s2780_s1 + $0xb0] sm:$0xf]  ;;  %v1436_v57 = vor.u32 %v1906_v51, %v1435_v49  ;;  %v1872_v60 = vld [vmem:[%s2780_s1 + $0x24] sm:$0xf0] }
  0x1a   :  { %686 = vmatpush.bf16.msra.mxu1 %v1388_v38  ;;  %v1890_v55 = vld [vmem:[%s2780_s1 + $0xb4] sm:$0xf0]  ;;  %v1500_v58 = vor.u32 %v1922_v53, %v1499_v52  ;;  %v1427_v61 = vld [vmem:[%s2780_s1 + $0x120] sm:$0xf]  ;;  %v1904_v63 = vld [vmem:[%s2780_s1 + $0x124] sm:$0xf0]  ;;  %v1300_v4 = vor.u32 %v1872_v60, %v1299_v59 }
  0x1b   :  { %674 = vmatpush.bf16.msra.mxu0 %v1316_v44  ;;  %v1372_v62 = vor.u32 %v1890_v55, %v1371_v54  ;;  %v1491_v0 = vld [vmem:[%s2780_s1 + $0x1a0] sm:$0xf]  ;;  %v1920_v1 = vld [vmem:[%s2780_s1 + $0x1a4] sm:$0xf0]  ;;  %v1428_v5 = vor.u32 %v1904_v63, %v1427_v61  ;;  %v1291_v7 = vld [vmem:[%s2780_s1 + $0x10] sm:$0xf] }
  0x1c   :  { %700 = vmatpush.bf16.msra.mxu2 %v1444_v45  ;;  %v1363_v2 = vld [vmem:[%s2780_s1 + $0xa0] sm:$0xf]  ;;  %v1888_v3 = vld [vmem:[%s2780_s1 + $0xa4] sm:$0xf0]  ;;  %v1492_v6 = vor.u32 %v1920_v1, %v1491_v0  ;;  %v1870_v8 = vld [vmem:[%s2780_s1 + $0x14] sm:$0xf0] }
  0x1d   :  { %713 = vmatpush.bf16.msra.mxu3 %v1508_v46  ;;  %v1419_v9 = vld [vmem:[%s2780_s1 + $0x110] sm:$0xf]  ;;  %v1364_v10 = vor.u32 %v1888_v3, %v1363_v2  ;;  %v1902_v11 = vld [vmem:[%s2780_s1 + $0x114] sm:$0xf0]  ;;  %v1292_v16 = vor.u32 %v1870_v8, %v1291_v7  ;;  %v1283_v17 = vld [vmem:[%s2780_s1] sm:$0xf] }
  0x1e   :  { %687 = vmatpush.bf16.msra.mxu1 %v1380_v50  ;;  %v1483_v12 = vld [vmem:[%s2780_s1 + $0x190] sm:$0xf]  ;;  %v1918_v13 = vld [vmem:[%s2780_s1 + $0x194] sm:$0xf0]  ;;  %v1868_v18 = vld [vmem:[%s2780_s1 + $0x4] sm:$0xf0]  ;;  %v1420_v20 = vor.u32 %v1902_v11, %v1419_v9 }
  0x1f   :  { %675 = vmatpush.bf16.msra.mxu0 %v1308_v56  ;;  %v1355_v14 = vld [vmem:[%s2780_s1 + $0x90] sm:$0xf]  ;;  %v1886_v15 = vld [vmem:[%s2780_s1 + $0x94] sm:$0xf0]  ;;  %v1411_v19 = vld [vmem:[%s2780_s1 + $0x100] sm:$0xf]  ;;  %v1484_v21 = vor.u32 %v1918_v13, %v1483_v12  ;;  %v1284_v32 = vor.u32 %v1868_v18, %v1283_v17 }
  0x20   :  { %701 = vmatpush.bf16.msra.mxu2 %v1436_v57  ;;  %v1900_v22 = vld [vmem:[%s2780_s1 + $0x104] sm:$0xf0]  ;;  %v1475_v23 = vld [vmem:[%s2780_s1 + $0x180] sm:$0xf]  ;;  %v1356_v25 = vor.u32 %v1886_v15, %v1355_v14  ;;  %v1595_v26 = vld [vmem:[%s2780_s1 + $0x270] sm:$0xf] }
  0x21   :  { %714 = vmatpush.bf16.msra.mxu3 %v1500_v58  ;;  %v1916_v24 = vld [vmem:[%s2780_s1 + $0x184] sm:$0xf0]  ;;  %v1946_v27 = vld [vmem:[%s2780_s1 + $0x274] sm:$0xf0]  ;;  %v1881_v28 = vld [vmem:[%s2780_s1 + $0x74] sm:$0xf]  ;;  %v1412_v36 = vor.u32 %v1900_v22, %v1411_v19 }
  0x22   :  { %688 = vmatpush.bf16.msra.mxu1 %v1372_v62  ;;  %v1341_v29 = vld [vmem:[%s2780_s1 + $0x78] sm:$0xf0]  ;;  %v1347_v30 = vld [vmem:[%s2780_s1 + $0x80] sm:$0xf]  ;;  %v1884_v31 = vld [vmem:[%s2780_s1 + $0x84] sm:$0xf0]  ;;  %v1476_v37 = vor.u32 %v1916_v24, %v1475_v23  ;;  %v1596_v41 = vor.u32 %v1946_v27, %v1595_v26 }
  0x23   :  { %676 = vmatpush.bf16.msra.mxu0 %v1300_v4  ;;  %v61_v33 = vld [vmem:[%s2779_s0 + $0x10] sm:$0xff]  ;;  %v1667_v34 = vld [vmem:[%s2780_s1 + $0x300] sm:$0xf]  ;;  %v1964_v35 = vld [vmem:[%s2780_s1 + $0x304] sm:$0xf0]  ;;  %v1344_v42 = vor.u32 %v1881_v28, %v1341_v29  ;;  %v1348_v46 = vor.u32 %v1884_v31, %v1347_v30  ;;  %vm667_vm0 = vcmask 130048  }
  0x24   :  { %702 = vmatpush.bf16.msra.mxu2 %v1428_v5  ;;  %v1659_v38 = vld [vmem:[%s2780_s1 + $0x2f0] sm:$0xf]  ;;  %v1962_v39 = vld [vmem:[%s2780_s1 + $0x2f4] sm:$0xf0]  ;;  %v1897_v40 = vld [vmem:[%s2780_s1 + $0xf4] sm:$0xf]  ;;  %v1668_v47 = vor.u32 %v1964_v35, %v1667_v34  ;;  %v2364_v51 = vpack.c.bf16 %v61_v33, %v61_v33 }
  0x25   :  { %715 = vmatpush.bf16.msra.mxu3 %v1492_v6  ;;  %v1405_v43 = vld [vmem:[%s2780_s1 + $0xf8] sm:$0xf0]  ;;  %v1587_v44 = vld [vmem:[%s2780_s1 + $0x260] sm:$0xf]  ;;  %v1944_v48 = vld [vmem:[%s2780_s1 + $0x264] sm:$0xf0]  ;;  %v1660_v52 = vor.u32 %v1962_v39, %v1659_v38 }
  0x26   :  { %689 = vmatpush.bf16.msra.mxu1 %v1364_v10  ;;  %v59_v45 = vld [vmem:[%s2779_s0] sm:$0xff]  ;;  %v1333_v50 = vld [vmem:[%s2780_s1 + $0x68] sm:$0xf0]  ;;  %v62_v53 = vld [vmem:[%s2779_s0 + $0x18] sm:$0xff]  ;;  %v1408_v55 = vor.u32 %v1897_v40, %v1405_v43  ;;  %v1588_v59 = vor.u32 %v1944_v48, %v1587_v44 }
  0x27   :  { %677 = vmatpush.bf16.msra.mxu0 %v1292_v16  ;;  %v1879_v49 = vld [vmem:[%s2780_s1 + $0x64] sm:$0xf]  ;;  %v60_v54 = vld [vmem:[%s2779_s0 + $0x8] sm:$0xff]  ;;  %v1651_v56 = vld [vmem:[%s2780_s1 + $0x2e0] sm:$0xf]  ;;  %v2378_v58 = vpack.c.bf16 %v59_v45, %v59_v45  ;;  %v2398_v3 = vpack.c.bf16 %v62_v53, %v62_v53 }
  0x28   :  { %703 = vmatpush.bf16.msra.mxu2 %v1420_v20  ;;  %v1960_v57 = vld [vmem:[%s2780_s1 + $0x2e4] sm:$0xf0]  ;;  %v1336_v60 = vor.u32 %v1879_v49, %v1333_v50  ;;  %v1895_v61 = vld [vmem:[%s2780_s1 + $0xe4] sm:$0xf]  ;;  %v1397_v62 = vld [vmem:[%s2780_s1 + $0xe8] sm:$0xf0]  ;;  %v2400_v4 = vpack.c.bf16 %v60_v54, %v60_v54 }
  0x29   :  { %716 = vmatpush.bf16.msra.mxu3 %v1484_v21  ;;  %v1579_v63 = vld [vmem:[%s2780_s1 + $0x250] sm:$0xf]  ;;  %v1942_v0 = vld [vmem:[%s2780_s1 + $0x254] sm:$0xf0]  ;;  %v1877_v1 = vld [vmem:[%s2780_s1 + $0x54] sm:$0xf]  ;;  %v1652_v5 = vor.u32 %v1960_v57, %v1651_v56  ;;  %v1400_v6 = vor.u32 %v1895_v61, %v1397_v62 }
  0x2a   :  { %690 = vmatpush.bf16.msra.mxu1 %v1356_v25  ;;  %v1325_v2 = vld [vmem:[%s2780_s1 + $0x58] sm:$0xf0]  ;;  %v1643_v7 = vld [vmem:[%s2780_s1 + $0x2d0] sm:$0xf]  ;;  %v1958_v8 = vld [vmem:[%s2780_s1 + $0x2d4] sm:$0xf0]  ;;  %v1580_v9 = vor.u32 %v1942_v0, %v1579_v63 }
  0x2b   :  { %678 = vmatpush.bf16.msra.mxu0 %v1284_v32  ;;  %v1328_v10 = vor.u32 %v1877_v1, %v1325_v2  ;;  %v1893_v11 = vld [vmem:[%s2780_s1 + $0xd4] sm:$0xf]  ;;  %v1389_v12 = vld [vmem:[%s2780_s1 + $0xd8] sm:$0xf0]  ;;  %v1571_v13 = vld [vmem:[%s2780_s1 + $0x240] sm:$0xf]  ;;  %v1644_v17 = vor.u32 %v1958_v8, %v1643_v7 }
  0x2c   :  { %704 = vmatpush.bf16.msra.mxu2 %v1412_v36  ;;  %v1940_v14 = vld [vmem:[%s2780_s1 + $0x244] sm:$0xf0]  ;;  %v1875_v15 = vld [vmem:[%s2780_s1 + $0x44] sm:$0xf]  ;;  %v1317_v16 = vld [vmem:[%s2780_s1 + $0x48] sm:$0xf0]  ;;  %v1392_v18 = vor.u32 %v1893_v11, %v1389_v12 }
  0x2d   :  { %717 = vmatpush.bf16.msra.mxu3 %v1476_v37  ;;  %v1635_v19 = vld [vmem:[%s2780_s1 + $0x2c0] sm:$0xf]  ;;  %v1956_v20 = vld [vmem:[%s2780_s1 + $0x2c4] sm:$0xf0]  ;;  %v1572_v21 = vor.u32 %v1940_v14, %v1571_v13  ;;  %v1320_v22 = vor.u32 %v1875_v15, %v1317_v16  ;;  %v1891_v23 = vld [vmem:[%s2780_s1 + $0xc4] sm:$0xf] }
  0x2e   :  { %691 = vmatpush.bf16.msra.mxu1 %v1348_v46  ;;  %679 = vmatmul.bf16.vlgmr.msra.gmra.mxu0 %v2378_v58  ;;  %v1381_v24 = vld [vmem:[%s2780_s1 + $0xc8] sm:$0xf0]  ;;  %v1563_v25 = vld [vmem:[%s2780_s1 + $0x230] sm:$0xf]  ;;  %v1938_v26 = vld [vmem:[%s2780_s1 + $0x234] sm:$0xf0]  ;;  %v1636_v29 = vor.u32 %v1956_v20, %v1635_v19 }
  0x2f   :  { %723 = vmatpush.bf16.msrb.mxu0 %v1596_v41  ;;  %705 = vmatmul.bf16.vlgmr.msra.gmra.mxu2 %v2364_v51  ;;  %v1873_v27 = vld [vmem:[%s2780_s1 + $0x34] sm:$0xf]  ;;  %v1309_v28 = vld [vmem:[%s2780_s1 + $0x38] sm:$0xf0]  ;;  %v1384_v30 = vor.u32 %v1891_v23, %v1381_v24  ;;  %v1627_v31 = vld [vmem:[%s2780_s1 + $0x2b0] sm:$0xf]  ;;  %v1564_v34 = vor.u32 %v1938_v26, %v1563_v25 }
  0x30   :  { %756 = vmatpush.bf16.msrb.mxu2 %v1668_v47  ;;  %718 = vmatmul.bf16.vlgmr.msra.gmra.mxu3 %v2398_v3  ;;  %v1954_v32 = vld [vmem:[%s2780_s1 + $0x2b4] sm:$0xf0]  ;;  %v65_v33 = vld [vmem:[%s2779_s0 + $0x30] sm:$0xff]  ;;  %v1312_v35 = vor.u32 %v1873_v27, %v1309_v28  ;;  %v1373_v37 = vld [vmem:[%s2780_s1 + $0xb8] sm:$0xf0] }
  0x31   :  { %762 = vmatpush.bf16.msrb.mxu3 %v1344_v42  ;;  %692 = vmatmul.bf16.vlgmr.msra.gmra.mxu1 %v2400_v4  ;;  %v1889_v36 = vld [vmem:[%s2780_s1 + $0xb4] sm:$0xf]  ;;  %v1555_v38 = vld [vmem:[%s2780_s1 + $0x220] sm:$0xf]  ;;  %v1936_v39 = vld [vmem:[%s2780_s1 + $0x224] sm:$0xf0]  ;;  %v1628_v42 = vor.u32 %v1954_v32, %v1627_v31  ;;  %v2481_v43 = vpack.c.bf16 %v65_v33, %v65_v33 }
  0x32   :  { %736 = vmatpush.bf16.msrb.mxu1 %v1660_v52  ;;  %v1871_v40 = vld [vmem:[%s2780_s1 + $0x24] sm:$0xf]  ;;  %v1301_v41 = vld [vmem:[%s2780_s1 + $0x28] sm:$0xf0]  ;;  %v1376_v44 = vor.u32 %v1889_v36, %v1373_v37  ;;  %v1619_v45 = vld [vmem:[%s2780_s1 + $0x2a0] sm:$0xf]  ;;  %v1556_v47 = vor.u32 %v1936_v39, %v1555_v38 }
  0x33   :  { %724 = vmatpush.bf16.msrb.mxu0 %v1588_v59  ;;  %v1952_v46 = vld [vmem:[%s2780_s1 + $0x2a4] sm:$0xf0]  ;;  %v1304_v48 = vor.u32 %v1871_v40, %v1301_v41  ;;  %v1887_v49 = vld [vmem:[%s2780_s1 + $0xa4] sm:$0xf]  ;;  %v1365_v50 = vld [vmem:[%s2780_s1 + $0xa8] sm:$0xf0] }
  0x34   :  { %775 = vmatpush.bf16.msra.mxu2 %v1408_v55  ;;  %v1547_v52 = vld [vmem:[%s2780_s1 + $0x210] sm:$0xf]  ;;  %v1934_v53 = vld [vmem:[%s2780_s1 + $0x214] sm:$0xf0]  ;;  %v1869_v54 = vld [vmem:[%s2780_s1 + $0x14] sm:$0xf]  ;;  %v1620_v56 = vor.u32 %v1952_v46, %v1619_v45  ;;  %v1368_v57 = vor.u32 %v1887_v49, %v1365_v50 }
  0x35   :  { %763 = vmatpush.bf16.msrb.mxu3 %v1336_v60  ;;  %v1293_v55 = vld [vmem:[%s2780_s1 + $0x18] sm:$0xf0]  ;;  %v1611_v59 = vld [vmem:[%s2780_s1 + $0x290] sm:$0xf]  ;;  %v1950_v60 = vld [vmem:[%s2780_s1 + $0x294] sm:$0xf0]  ;;  %v1548_v62 = vor.u32 %v1934_v53, %v1547_v52 }
  0x36   :  { %737 = vmatpush.bf16.msrb.mxu1 %v1652_v5  ;;  %v1885_v61 = vld [vmem:[%s2780_s1 + $0x94] sm:$0xf]  ;;  %v1296_v63 = vor.u32 %v1869_v54, %v1293_v55  ;;  %v1357_v0 = vld [vmem:[%s2780_s1 + $0x98] sm:$0xf0]  ;;  %v1539_v1 = vld [vmem:[%s2780_s1 + $0x200] sm:$0xf]  ;;  %v1612_v8 = vor.u32 %v1950_v60, %v1611_v59 }
  0x37   :  { %725 = vmatpush.bf16.msrb.mxu0 %v1580_v9  ;;  %v1932_v2 = vld [vmem:[%s2780_s1 + $0x204] sm:$0xf0]  ;;  %v1867_v5 = vld [vmem:[%s2780_s1 + $0x4] sm:$0xf]  ;;  %v1913_v7 = vld [vmem:[%s2780_s1 + $0x174] sm:$0xf]  ;;  %v1360_v12 = vor.u32 %v1885_v61, %v1357_v0 }
  0x38   :  { %776 = vmatpush.bf16.msra.mxu2 %v1400_v6  ;;  %v1285_v6 = vld [vmem:[%s2780_s1 + $0x8] sm:$0xf0]  ;;  %v1469_v9 = vld [vmem:[%s2780_s1 + $0x178] sm:$0xf0]  ;;  %v1603_v13 = vld [vmem:[%s2780_s1 + $0x280] sm:$0xf]  ;;  %v1540_v16 = vor.u32 %v1932_v2, %v1539_v1 }
  0x39   :  { %764 = vmatpush.bf16.msrb.mxu3 %v1328_v10  ;;  %v1945_v10 = vld [vmem:[%s2780_s1 + $0x274] sm:$0xf]  ;;  %v1597_v11 = vld [vmem:[%s2780_s1 + $0x278] sm:$0xf0]  ;;  %v1948_v14 = vld [vmem:[%s2780_s1 + $0x284] sm:$0xf0] }
  0x3a   :  { %738 = vmatpush.bf16.msrb.mxu1 %v1644_v17  ;;  %v63_v15 = vld [vmem:[%s2779_s0 + $0x20] sm:$0xff]  ;;  %v1288_v17 = vor.u32 %v1867_v5, %v1285_v6  ;;  %v1349_v19 = vld [vmem:[%s2780_s1 + $0x88] sm:$0xf0]  ;;  %v1929_v20 = vld [vmem:[%s2780_s1 + $0x1f4] sm:$0xf]  ;;  %v1604_v26 = vor.u32 %v1948_v14, %v1603_v13 }
  0x3b   :  { %726 = vmatpush.bf16.msrb.mxu0 %v1572_v21  ;;  %v1472_v21 = vor.u32 %v1913_v7, %v1469_v9  ;;  %v1533_v23 = vld [vmem:[%s2780_s1 + $0x1f8] sm:$0xf0]  ;;  %v1961_v24 = vld [vmem:[%s2780_s1 + $0x2f4] sm:$0xf]  ;;  %v64_v27 = vld [vmem:[%s2779_s0 + $0x28] sm:$0xff] }
  0x3c   :  { %777 = vmatpush.bf16.msra.mxu2 %v1392_v18  ;;  %v1883_v18 = vld [vmem:[%s2780_s1 + $0x84] sm:$0xf]  ;;  %v1661_v25 = vld [vmem:[%s2780_s1 + $0x2f8] sm:$0xf0]  ;;  %v1589_v33 = vld [vmem:[%s2780_s1 + $0x268] sm:$0xf0]  ;;  %v2592_v37 = vpack.c.bf16 %v64_v27, %v64_v27 }
  0x3d   :  { %765 = vmatpush.bf16.msrb.mxu3 %v1320_v22  ;;  %v1600_v22 = vor.u32 %v1945_v10, %v1597_v11  ;;  %v1911_v28 = vld [vmem:[%s2780_s1 + $0x164] sm:$0xf]  ;;  %v1352_v31 = vor.u32 %v1883_v18, %v1349_v19  ;;  %v1525_v39 = vld [vmem:[%s2780_s1 + $0x1e8] sm:$0xf0]  ;;  %v1453_v45 = vld [vmem:[%s2780_s1 + $0x158] sm:$0xf0] }
  0x3e   :  { %739 = vmatpush.bf16.msrb.mxu1 %v1636_v29  ;;  %v1461_v29 = vld [vmem:[%s2780_s1 + $0x168] sm:$0xf0]  ;;  %v1943_v32 = vld [vmem:[%s2780_s1 + $0x264] sm:$0xf]  ;;  %v1941_v46 = vld [vmem:[%s2780_s1 + $0x254] sm:$0xf] }
  0x3f   :  { %727 = vmatpush.bf16.msrb.mxu0 %v1564_v34  ;;  %1673 = vmatmul.msk.bf16.vlgmr.msrb.gmra.mxu2 %vm667_vm0, %v2481_v43  ;;  %v1536_v34 = vor.u32 %v1929_v20, %v1533_v23  ;;  %v1927_v36 = vld [vmem:[%s2780_s1 + $0x1e4] sm:$0xf]  ;;  %v1464_v38 = vor.u32 %v1911_v28, %v1461_v29  ;;  %v1653_v41 = vld [vmem:[%s2780_s1 + $0x2e8] sm:$0xf0]  ;;  %v1925_v50 = vld [vmem:[%s2780_s1 + $0x1d4] sm:$0xf] }
  0x40   :  { %778 = vmatpush.bf16.msra.mxu2 %v1384_v30  ;;  %v2581_v30 = vpack.c.bf16 %v63_v15, %v63_v15  ;;  %v1959_v40 = vld [vmem:[%s2780_s1 + $0x2e4] sm:$0xf]  ;;  %v1517_v53 = vld [vmem:[%s2780_s1 + $0x1d8] sm:$0xf0]  ;;  %v1957_v54 = vld [vmem:[%s2780_s1 + $0x2d4] sm:$0xf] }
  0x41   :  { %766 = vmatpush.bf16.msrb.mxu3 %v1312_v35  ;;  %v1664_v35 = vor.u32 %v1961_v24, %v1661_v25  ;;  %v1656_v49 = vor.u32 %v1959_v40, %v1653_v41  ;;  %v1645_v55 = vld [vmem:[%s2780_s1 + $0x2d8] sm:$0xf0]  ;;  %v1445_v59 = vld [vmem:[%s2780_s1 + $0x148] sm:$0xf0]  ;;  %v1939_v60 = vld [vmem:[%s2780_s1 + $0x244] sm:$0xf] }
  0x42   :  { %740 = vmatpush.bf16.msrb.mxu1 %v1628_v42  ;;  %v1592_v42 = vor.u32 %v1943_v32, %v1589_v33  ;;  %v1573_v61 = vld [vmem:[%s2780_s1 + $0x248] sm:$0xf0]  ;;  %v1923_v0 = vld [vmem:[%s2780_s1 + $0x1c4] sm:$0xf]  ;;  %v1905_v6 = vld [vmem:[%s2780_s1 + $0x134] sm:$0xf] }
  0x43   :  { %728 = vmatpush.bf16.msrb.mxu0 %v1556_v47  ;;  %v1581_v47 = vld [vmem:[%s2780_s1 + $0x258] sm:$0xf0]  ;;  %v1509_v1 = vld [vmem:[%s2780_s1 + $0x1c8] sm:$0xf0]  ;;  %v1955_v2 = vld [vmem:[%s2780_s1 + $0x2c4] sm:$0xf]  ;;  %v1576_v5 = vor.u32 %v1939_v60, %v1573_v61 }
  0x44   :  { %779 = vmatpush.bf16.msra.mxu2 %v1376_v44  ;;  %v1909_v44 = vld [vmem:[%s2780_s1 + $0x154] sm:$0xf]  ;;  %v1437_v7 = vld [vmem:[%s2780_s1 + $0x138] sm:$0xf0]  ;;  %v1512_v10 = vor.u32 %v1923_v0, %v1509_v1  ;;  %v1903_v18 = vld [vmem:[%s2780_s1 + $0x124] sm:$0xf] }
  0x45   :  { %767 = vmatpush.bf16.msrb.mxu3 %v1304_v48  ;;  %v1528_v48 = vor.u32 %v1927_v36, %v1525_v39  ;;  %v1456_v52 = vor.u32 %v1909_v44, %v1453_v45  ;;  %v1565_v9 = vld [vmem:[%s2780_s1 + $0x238] sm:$0xf0]  ;;  %v1440_v13 = vor.u32 %v1905_v6, %v1437_v7  ;;  %v1953_v15 = vld [vmem:[%s2780_s1 + $0x2b4] sm:$0xf]  ;;  %v1429_v19 = vld [vmem:[%s2780_s1 + $0x128] sm:$0xf0] }
  0x46   :  { %741 = vmatpush.bf16.msrb.mxu1 %v1620_v56  ;;  %v1584_v56 = vor.u32 %v1941_v46, %v1581_v47  ;;  %v1501_v14 = vld [vmem:[%s2780_s1 + $0x1b8] sm:$0xf0]  ;;  %v1935_v20 = vld [vmem:[%s2780_s1 + $0x224] sm:$0xf]  ;;  %v1432_v25 = vor.u32 %v1903_v18, %v1429_v19  ;;  %v1621_v28 = vld [vmem:[%s2780_s1 + $0x2a8] sm:$0xf0] }
  0x47   :  { %729 = vmatpush.bf16.msrb.mxu0 %v1548_v62  ;;  %v1520_v62 = vor.u32 %v1925_v50, %v1517_v53  ;;  %v1919_v24 = vld [vmem:[%s2780_s1 + $0x1a4] sm:$0xf]  ;;  %v1421_v32 = vld [vmem:[%s2780_s1 + $0x118] sm:$0xf0]  ;;  %v1933_v33 = vld [vmem:[%s2780_s1 + $0x214] sm:$0xf] }
  0x48   :  { %780 = vmatpush.bf16.msra.mxu2 %v1368_v57  ;;  %v1907_v57 = vld [vmem:[%s2780_s1 + $0x144] sm:$0xf]  ;;  %v1485_v40 = vld [vmem:[%s2780_s1 + $0x198] sm:$0xf0]  ;;  %v1949_v41 = vld [vmem:[%s2780_s1 + $0x294] sm:$0xf] }
  0x49   :  { %768 = vmatpush.bf16.msrb.mxu3 %v1296_v63  ;;  %v1648_v63 = vor.u32 %v1957_v54, %v1645_v55  ;;  %v1951_v27 = vld [vmem:[%s2780_s1 + $0x2a4] sm:$0xf]  ;;  %v1413_v46 = vld [vmem:[%s2780_s1 + $0x108] sm:$0xf0]  ;;  %v1733_v0 = vld [vmem:[#allocation2 + $0x70] sm:$0xf] }
  0x4a   :  { %742 = vmatpush.bf16.msrb.mxu1 %v1612_v8  ;;  %v1937_v8 = vld [vmem:[%s2780_s1 + $0x234] sm:$0xf]  ;;  %v1624_v36 = vor.u32 %v1951_v27, %v1621_v28  ;;  %v1899_v45 = vld [vmem:[%s2780_s1 + $0x104] sm:$0xf]  ;;  %v1669_v50 = vld [vmem:[%s2780_s1 + $0x308] sm:$0xf0] }
  0x4b   :  { %730 = vmatpush.bf16.msrb.mxu0 %v1540_v16  ;;  %v1629_v16 = vld [vmem:[%s2780_s1 + $0x2b8] sm:$0xf0]  ;;  %v1931_v47 = vld [vmem:[%s2780_s1 + $0x204] sm:$0xf]  ;;  %v1416_v54 = vor.u32 %v1899_v45, %v1413_v46  ;;  %v1605_v60 = vld [vmem:[%s2780_s1 + $0x288] sm:$0xf0] }
  0x4c   :  { %781 = vmatpush.bf16.msra.mxu2 %v1360_v12  ;;  %v1921_v12 = vld [vmem:[%s2780_s1 + $0x1b4] sm:$0xf]  ;;  %v1632_v23 = vor.u32 %v1953_v15, %v1629_v16  ;;  %v1915_v55 = vld [vmem:[%s2780_s1 + $0x184] sm:$0xf]  ;;  %v1725_v6 = vld [vmem:[#allocation2 + $0x60] sm:$0xf] }
  0x4d   :  { %769 = vmatpush.bf16.msrb.mxu3 %v1288_v17  ;;  %v1568_v17 = vor.u32 %v1937_v8, %v1565_v9  ;;  %v1977_v7 = vld [vmem:[#allocation2 + $0x64] sm:$0xf]  ;;  %v1727_v8 = vld [vmem:[#allocation2 + $0x68] sm:$0xf0]  ;;  %v1717_v9 = vld [vmem:[#allocation2 + $0x50] sm:$0xf] }
  0x4e   :  { %743 = vmatpush.bf16.msrb.mxu1 %v1604_v26  ;;  %731 = vmatmul.bf16.vlgmr.msrb.gmra.mxu0 %v2581_v30  ;;  %v1493_v26 = vld [vmem:[%s2780_s1 + $0x1a8] sm:$0xf0]  ;;  %v1973_v15 = vld [vmem:[#allocation2 + $0x44] sm:$0xf]  ;;  %v1701_v19 = vld [vmem:[#allocation2 + $0x30] sm:$0xf] }
  0x4f   :  { %788 = vmatpush.bf16.msra.mxu0 %v1472_v21  ;;  %v1557_v21 = vld [vmem:[%s2780_s1 + $0x228] sm:$0xf0]  ;;  %v1969_v27 = vld [vmem:[#allocation2 + $0x24] sm:$0xf] }
  0x50   :  { %782 = vmatpush.bf16.msra.mxu2 %v1352_v31  ;;  %770 = vmatmul.bf16.vlgmr.msrb.gmra.mxu3 %v2378_v58  ;;  %v1637_v58 = vld [vmem:[%s2780_s1 + $0x2c8] sm:$0xf0]  ;;  %v1560_v29 = vor.u32 %v1935_v20, %v1557_v21  ;;  %v1901_v31 = vld [vmem:[%s2780_s1 + $0x114] sm:$0xf]  ;;  %v1972_v20 = vld [vmem:[#allocation2 + $0x34] sm:$0xf0] }
  0x51   :  { %814 = vmatpush.bf16.msra.mxu3 %v1600_v22  ;;  %744 = vmatmul.bf16.vlgmr.msrb.gmra.mxu1 %v2592_v37  ;;  %v1640_v11 = vor.u32 %v1955_v2, %v1637_v58  ;;  %v1504_v22 = vor.u32 %v1921_v12, %v1501_v14  ;;  %v1424_v39 = vor.u32 %v1901_v31, %v1421_v32  ;;  %v1979_v2 = vld [vmem:[#allocation2 + $0x74] sm:$0xf]  ;;  %v1735_v58 = vld [vmem:[#allocation2 + $0x78] sm:$0xf0]  ;;  %v1974_v14 = vld [vmem:[#allocation2 + $0x44] sm:$0xf0] }
  0x52   :  { %801 = vmatpush.bf16.msra.mxu1 %v1536_v34  ;;  %v1549_v34 = vld [vmem:[%s2780_s1 + $0x218] sm:$0xf0]  ;;  %v1711_v16 = vld [vmem:[#allocation2 + $0x48] sm:$0xf0]  ;;  %v1971_v21 = vld [vmem:[#allocation2 + $0x34] sm:$0xf] }
  0x53   :  { %789 = vmatpush.bf16.msra.mxu0 %v1464_v38  ;;  %783 = vmatmul.bf16.vlgmr.msra.gmra.mxu2 %v2400_v4  ;;  %v1448_v4 = vor.u32 %v1907_v57, %v1445_v59  ;;  %v1917_v38 = vld [vmem:[%s2780_s1 + $0x194] sm:$0xf]  ;;  %v1552_v44 = vor.u32 %v1933_v33, %v1549_v34  ;;  %v1947_v59 = vld [vmem:[%s2780_s1 + $0x284] sm:$0xf]  ;;  %v1714_v18 = vor.u32 %v1973_v15, %v1711_v16  ;;  %v1685_v33 = vld [vmem:[#allocation2 + $0x10] sm:$0xf] }
  0x54   :  { %827 = vmatpush.bf16.msrb.mxu2 %v1664_v35  ;;  %v1496_v35 = vor.u32 %v1919_v24, %v1493_v26  ;;  %v1970_v26 = vld [vmem:[#allocation2 + $0x24] sm:$0xf0]  ;;  %v1968_v34 = vld [vmem:[#allocation2 + $0x14] sm:$0xf0]  ;;  %v1773_v15 = vld [vmem:[#allocation2 + $0xc0] sm:$0xf] }
  0x55   :  { %815 = vmatpush.bf16.msra.mxu3 %v1592_v42  ;;  %v1613_v42 = vld [vmem:[%s2780_s1 + $0x298] sm:$0xf0]  ;;  %v1990_v16 = vld [vmem:[#allocation2 + $0xc4] sm:$0xf0] }
  0x56   :  { %802 = vmatpush.bf16.msra.mxu1 %v1528_v48  ;;  %v1541_v48 = vld [vmem:[%s2780_s1 + $0x208] sm:$0xf0]  ;;  %v1616_v53 = vor.u32 %v1949_v41, %v1613_v42  ;;  %v1677_v41 = vld [vmem:[#allocation2] sm:$0xf]  ;;  %v1966_v42 = vld [vmem:[#allocation2 + $0x4] sm:$0xf0] }
  0x57   :  { %790 = vmatpush.bf16.msra.mxu0 %v1456_v52  ;;  %v1488_v52 = vor.u32 %v1917_v38, %v1485_v40  ;;  %v1544_v57 = vor.u32 %v1931_v47, %v1541_v48  ;;  %v1687_v38 = vld [vmem:[#allocation2 + $0x18] sm:$0xf0]  ;;  %v1678_v46 = vor.u32 %v1966_v42, %v1677_v41  ;;  %v1679_v47 = vld [vmem:[#allocation2 + $0x8] sm:$0xf0] }
  0x58   :  { %828 = vmatpush.bf16.msrb.mxu2 %v1656_v49  ;;  %v1963_v49 = vld [vmem:[%s2780_s1 + $0x304] sm:$0xf]  ;;  %v1759_v42 = vld [vmem:[#allocation2 + $0xa8] sm:$0xf0] }
  0x59   :  { %816 = vmatpush.bf16.msra.mxu3 %v1584_v56  ;;  %v1477_v56 = vld [vmem:[%s2780_s1 + $0x188] sm:$0xf0]  ;;  %v1672_v61 = vor.u32 %v1963_v49, %v1669_v50  ;;  %v2766_v49 = vld [vmem:[%s2781_s2] sm:$0x3] }
  0x5a   :  { %803 = vmatpush.bf16.msra.mxu1 %v1520_v62  ;;  %v1480_v62 = vor.u32 %v1915_v55, %v1477_v56 }
  0x5b   :  { %791 = vmatpush.bf16.msra.mxu0 %v1448_v4  ;;  %v1980_v4 = vld [vmem:[#allocation2 + $0x74] sm:$0xf0] }
  0x5c   :  { %829 = vmatpush.bf16.msrb.mxu2 %v1648_v63  ;;  %v1608_v63 = vor.u32 %v1947_v59, %v1605_v60  ;;  %v1734_v1 = vor.u32 %v1980_v4, %v1733_v0  ;;  %v1799_v59 = vld [vmem:[#allocation2 + $0xf8] sm:$0xf0]  ;;  %v173_v60 = vperm.slane %v2766_v49, 0  ;;  %v1994_v0 = vld [vmem:[#allocation2 + $0xe4] sm:$0xf0] }
  0x5d   :  { %817 = vmatpush.bf16.msra.mxu3 %v1576_v5  ;;  %v1738_v5 = vor.u32 %v1979_v2, %v1735_v58  ;;  %v1993_v4 = vld [vmem:[#allocation2 + $0xe4] sm:$0xf]  ;;  %v1791_v58 = vld [vmem:[#allocation2 + $0xe8] sm:$0xf0] }
  0x5e   :  { %804 = vmatpush.bf16.msra.mxu1 %v1512_v10  ;;  %v1730_v10 = vor.u32 %v1977_v7, %v1727_v8  ;;  %v1781_v8 = vld [vmem:[#allocation2 + $0xd0] sm:$0xf] }
  0x5f   :  { %792 = vmatpush.bf16.msra.mxu0 %v1440_v13  ;;  %v1709_v13 = vld [vmem:[#allocation2 + $0x40] sm:$0xf] }
  0x60   :  { %830 = vmatpush.bf16.msrb.mxu2 %v1640_v11  ;;  %v1719_v11 = vld [vmem:[#allocation2 + $0x58] sm:$0xf0] }
  0x61   :  { %818 = vmatpush.bf16.msra.mxu3 %v1568_v17  ;;  %v1710_v17 = vor.u32 %v1974_v14, %v1709_v13 }
  0x62   :  { %805 = vmatpush.bf16.msra.mxu1 %v1504_v22  ;;  %v1703_v22 = vld [vmem:[#allocation2 + $0x38] sm:$0xf0] }
  0x63   :  { %793 = vmatpush.bf16.msra.mxu0 %v1432_v25  ;;  %v1706_v24 = vor.u32 %v1971_v21, %v1703_v22  ;;  %v1693_v25 = vld [vmem:[#allocation2 + $0x20] sm:$0xf] }
  0x64   :  { %831 = vmatpush.bf16.msrb.mxu2 %v1632_v23  ;;  %v1702_v23 = vor.u32 %v1972_v20, %v1701_v19  ;;  %v1694_v28 = vor.u32 %v1970_v26, %v1693_v25  ;;  %v1774_v19 = vor.u32 %v1990_v16, %v1773_v15  ;;  %v1775_v20 = vld [vmem:[#allocation2 + $0xc8] sm:$0xf0]  ;;  %v1988_v25 = vld [vmem:[#allocation2 + $0xb4] sm:$0xf0]  ;;  %v1987_v26 = vld [vmem:[#allocation2 + $0xb4] sm:$0xf] }
  0x65   :  { %819 = vmatpush.bf16.msra.mxu3 %v1560_v29  ;;  %v1695_v29 = vld [vmem:[#allocation2 + $0x28] sm:$0xf0]  ;;  %v2012_v15 = vld [vmem:[#allocation4 + $0x78] sm:$0xff]  ;;  %v2003_v16 = vld [vmem:[#allocation4 + $0x30] sm:$0xff] }
  0x66   :  { %806 = vmatpush.bf16.msra.mxu1 %v1496_v35  ;;  %v1698_v31 = vor.u32 %v1969_v27, %v1695_v29  ;;  %v1967_v35 = vld [vmem:[#allocation2 + $0x14] sm:$0xf] }
  0x67   :  { %794 = vmatpush.bf16.msra.mxu0 %v1424_v39  ;;  %v1690_v40 = vor.u32 %v1967_v35, %v1687_v38  ;;  %v1757_v35 = vld [vmem:[#allocation2 + $0xa0] sm:$0xf]  ;;  %v1985_v38 = vld [vmem:[#allocation2 + $0xa4] sm:$0xf] }
  0x68   :  { %832 = vmatpush.bf16.msrb.mxu2 %v1624_v36  ;;  %v1686_v36 = vor.u32 %v1968_v34, %v1685_v33 }
  0x69   :  { %820 = vmatpush.bf16.msra.mxu3 %v1552_v44  ;;  %v1965_v44 = vld [vmem:[#allocation2 + $0x4] sm:$0xf] }
  0x6a   :  { %807 = vmatpush.bf16.msra.mxu1 %v1488_v52  ;;  %v1682_v48 = vor.u32 %v1965_v44, %v1679_v47  ;;  %v1984_v47 = vld [vmem:[#allocation2 + $0x94] sm:$0xf0] }
  0x6b   :  { %795 = vmatpush.bf16.msra.mxu0 %v1416_v54  ;;  %v1996_v54 = vld [vmem:[#allocation2 + $0xf4] sm:$0xf0] }
  0x6c   :  { %833 = vmatpush.bf16.msrb.mxu2 %v1616_v53  ;;  %v1797_v53 = vld [vmem:[#allocation2 + $0xf0] sm:$0xf] }
  0x6d   :  { %821 = vmatpush.bf16.msra.mxu3 %v1544_v57  ;;  %v1798_v56 = vor.u32 %v1996_v54, %v1797_v53  ;;  %v1995_v57 = vld [vmem:[#allocation2 + $0xf4] sm:$0xf] }
  0x6e   :  { %808 = vmatpush.bf16.msra.mxu1 %v1480_v62  ;;  %796 = vmatmul.bf16.vlgmr.msra.gmra.mxu0 %v2364_v51  ;;  %v1978_v51 = vld [vmem:[#allocation2 + $0x64] sm:$0xf0] }
  0x6f   :  { %847 = vmatpush.bf16.msrb.mxu0 %v1672_v61  ;;  %v1802_v61 = vor.u32 %v1995_v57, %v1799_v59  ;;  %v1981_v57 = vld [vmem:[#allocation2 + $0x84] sm:$0xf] }
  0x70   :  { %822 = vmatmul.bf16.vlgmr.msra.gmra.mxu3 %v2581_v30  ;;  %834 = vmatpush.bf16.msrb.mxu2 %v1608_v63  ;;  %v1726_v30 = vor.u32 %v1978_v51, %v1725_v6  ;;  %v1789_v63 = vld [vmem:[#allocation2 + $0xe0] sm:$0xf]  ;;  %v1794_v6 = vor.u32 %v1993_v4, %v1791_v58 }
  0x71   :  { %809 = vmatmul.bf16.vlgmr.msra.gmra.mxu1 %v2398_v3  ;;  %v1976_v3 = vld [vmem:[#allocation2 + $0x54] sm:$0xf0]  ;;  %1070 = vmatpush.bf16.msrb.mxu3 %v1798_v56  ;;  %v1790_v2 = vor.u32 %v1994_v0, %v1789_v63  ;;  %v1982_v56 = vld [vmem:[#allocation2 + $0x84] sm:$0xf0]  ;;  %v174_v63 = vperm.slane %v2766_v49, 1 }
  0x72   :  { %1057 = vmatpush.bf16.msrb.mxu1 %v1734_v1 }
  0x73   :  { %835 = vmatmul.bf16.vlgmr.msrb.gmra.mxu2 %v2592_v37  ;;  %1083 = vmatpush.bf16.msra.mxu0 %v1738_v5  ;;  %v1975_v37 = vld [vmem:[#allocation2 + $0x54] sm:$0xf] }
  0x74   :  { %v1722_v12 = vor.u32 %v1975_v37, %v1719_v11  ;;  %1096 = vmatpush.bf16.msra.mxu2 %v1802_v61  ;;  %v1783_v37 = vld [vmem:[#allocation2 + $0xd8] sm:$0xf0]  ;;  %v1743_v61 = vld [vmem:[#allocation2 + $0x88] sm:$0xf0] }
  0x75   :  { %1071 = vmatpush.bf16.msrb.mxu3 %v1790_v2 }
  0x76   :  { %1058 = vmatpush.bf16.msrb.mxu1 %v1726_v30 }
  0x77   :  { %1084 = vmatpush.bf16.msra.mxu0 %v1730_v10 }
  0x78   :  { %1097 = vmatpush.bf16.msra.mxu2 %v1794_v6 }
  0x7b   :  { %1085 = vmatpush.bf16.msra.mxu0 %v1722_v12 }
  0x7e   :  { %1674 = vmatmul.msk.bf16.vlgmr.msrb.gmra.mxu0 %vm667_vm0, %v2481_v43  ;;  %v1718_v43 = vor.u32 %v1976_v3, %v1717_v9  ;;  %v1992_v9 = vld [vmem:[#allocation2 + $0xd4] sm:$0xf0]  ;;  %v1991_v3 = vld [vmem:[#allocation2 + $0xd4] sm:$0xf] }
  0x7f   :  { %1086 = vmatpush.bf16.msra.mxu0 %v1714_v18  ;;  %v1782_v10 = vor.u32 %v1992_v9, %v1781_v8 }
  0x80   :  { %1059 = vmatpush.bf16.msrb.mxu1 %v1718_v43  ;;  %v1786_v43 = vor.u32 %v1991_v3, %v1783_v37 }
  0x81   :  { %1072 = vmatpush.bf16.msrb.mxu3 %v1782_v10 }
  0x82   :  { %1098 = vmatpush.bf16.msra.mxu2 %v1786_v43 }
  0x83   :  { %1087 = vmatpush.bf16.msra.mxu0 %v1706_v24  ;;  %v1765_v24 = vld [vmem:[#allocation2 + $0xb0] sm:$0xf] }
  0x84   :  { %1060 = vmatpush.bf16.msrb.mxu1 %v1710_v17  ;;  %v1989_v17 = vld [vmem:[#allocation2 + $0xc4] sm:$0xf]  ;;  %v1766_v27 = vor.u32 %v1988_v25, %v1765_v24  ;;  %v1999_v24 = vld [vmem:[#allocation4 + $0x10] sm:$0xff] }
  0x85   :  { %v1778_v22 = vor.u32 %v1989_v17, %v1775_v20  ;;  %1073 = vmatpush.bf16.msrb.mxu3 %v1774_v19  ;;  %v2011_v17 = vld [vmem:[#allocation4 + $0x70] sm:$0xff]  ;;  %v2010_v19 = vld [vmem:[#allocation4 + $0x68] sm:$0xff]  ;;  %v2001_v20 = vld [vmem:[#allocation4 + $0x20] sm:$0xff] }
  0x86   :  { %v2007_v25 = vld [vmem:[#allocation4 + $0x50] sm:$0xff] }
  0x87   :  { %1088 = vmatpush.bf16.msra.mxu0 %v1698_v31  ;;  %1099 = vmatpush.bf16.msra.mxu2 %v1778_v22  ;;  %v2000_v22 = vld [vmem:[#allocation4 + $0x18] sm:$0xff] }
  0x88   :  { %1061 = vmatpush.bf16.msrb.mxu1 %v1702_v23 }
  0x89   :  { %1074 = vmatpush.bf16.msrb.mxu3 %v1766_v27 }
  0x8b   :  { %1089 = vmatpush.bf16.msra.mxu0 %v1690_v40 }
  0x8c   :  { %1062 = vmatpush.bf16.msrb.mxu1 %v1694_v28  ;;  %v1767_v28 = vld [vmem:[#allocation2 + $0xb8] sm:$0xf0] }
  0x8d   :  { %v1770_v31 = vor.u32 %v1987_v26, %v1767_v28 }
  0x8f   :  { %1090 = vmatpush.bf16.msra.mxu0 %v1682_v48  ;;  %1100 = vmatpush.bf16.msra.mxu2 %v1770_v31  ;;  %v1983_v48 = vld [vmem:[#allocation2 + $0x94] sm:$0xf]  ;;  %v1998_v31 = vld [vmem:[#allocation4 + $0x8] sm:$0xff] }
  0x90   :  { %1063 = vmatpush.bf16.msrb.mxu1 %v1686_v36  ;;  %v1986_v36 = vld [vmem:[#allocation2 + $0xa4] sm:$0xf0] }
  0x91   :  { %v1758_v41 = vor.u32 %v1986_v36, %v1757_v35  ;;  %v891_v35 = vld [vmem:[%s2783_s4] sm:$0x3] }
  0x92   :  { %v893_v36 = vperm.slane %v891_v35, 0 }
  0x93   :  { %1075 = vmatpush.bf16.msrb.mxu3 %v1758_v41 }
  0x94   :  { %1064 = vmatpush.bf16.msrb.mxu1 %v1678_v46  ;;  %v1749_v46 = vld [vmem:[#allocation2 + $0x90] sm:$0xf] }
  0xab   :  { %v680_v32 = vpop.f32.mrf.mxu0 }
  0xac   :  { %v681_v1 = vadd.f32 %v680_v32, %v173_v60 }
  0xae   :  { %v693_v39 = vpop.f32.mrf.mxu1 }
  0xaf   :  { %v694_v51 = vadd.f32 %v693_v39, %v681_v1 }
  0xb2   :  { %v706_v45 = vpop.f32.mrf.mxu2 }
  0xb3   :  { %v719_v50 = vpop.f32.mrf.mxu3  ;;  %v682_v52 = vpop.f32.mrf.mxu0  ;;  %v707_v30 = vadd.f32 %v706_v45, %v694_v51  ;;  %v1762_v45 = vor.u32 %v1985_v38, %v1759_v42  ;;  %v894_v38 = vperm.slane %v891_v35, 1 }
  0xb4   :  { %v1751_v52 = vld [vmem:[#allocation2 + $0x98] sm:$0xf0] }
  0xb5   :  { %v720_v11 = vadd.f32 %v719_v50, %v707_v30  ;;  %1101 = vmatpush.bf16.msra.mxu2 %v1762_v45  ;;  %v1750_v50 = vor.u32 %v1984_v47, %v1749_v46  ;;  %v1754_v53 = vor.u32 %v1983_v48, %v1751_v52 }
  0xb6   :  { %v695_v55 = vpop.f32.mrf.mxu1 }
  0xb7   :  { %1076 = vmatpush.bf16.msrb.mxu3 %v1750_v50  ;;  %v1741_v55 = vld [vmem:[#allocation2 + $0x80] sm:$0xf] }
  0xb8   :  { %v1742_v60 = vor.u32 %v1982_v56, %v1741_v55 }
  0xb9   :  { %1102 = vmatpush.bf16.msra.mxu2 %v1754_v53 }
  0xba   :  { %v708_v62 = vpop.f32.mrf.mxu2 }
  0xbb   :  { %v721_v5 = vpop.f32.mrf.mxu3  ;;  %v1746_v62 = vor.u32 %v1981_v57, %v1743_v61  ;;  %1077 = vmatpush.bf16.msrb.mxu3 %v1742_v60  ;;  %v2019_v57 = vld [vmem:[%s2785_s6] ss:$0 sm:$0xff] }
  0xbd   :  { %1103 = vmatpush.bf16.msra.mxu2 %v1746_v62 }
  0xbf   :  { %1260 = vmatpush.bf16.msra.mxu3 %v2012_v15 }
  0xc2   :  { %v758_v7 = vpop.f32.mrf.mxu2 }
  0xc3   :  { %1261 = vmatpush.bf16.msra.mxu3 %v2011_v17 }
  0xc7   :  { %1262 = vmatpush.bf16.msra.mxu3 %v2010_v19 }
  0xca   :  { %v760_v14 = vpop.f32.mrf.mxu2 }
  0xcb   :  { %v732_v12 = vpop.f32.mrf.mxu0  ;;  %v2004_v14 = vld [vmem:[#allocation4 + $0x38] sm:$0xff] }
  0xcc   :  { %v733_v13 = vadd.f32 %v732_v12, %v720_v11  ;;  %1247 = vmatpush.bf16.msra.mxu1 %v2004_v14 }
  0xce   :  { %v745_v18 = vpop.f32.mrf.mxu1 }
  0xcf   :  { %v746_v21 = vadd.f32 %v745_v18, %v733_v13  ;;  %v2002_v18 = vld [vmem:[#allocation4 + $0x28] sm:$0xff] }
  0xd0   :  { %1248 = vmatpush.bf16.msra.mxu1 %v2003_v16 }
  0xd1   :  { %v759_v23 = vadd.f32 %v758_v7, %v746_v21  ;;  %v2009_v21 = vld [vmem:[#allocation4 + $0x60] sm:$0xff] }
  0xd2   :  { %1263 = vmatpush.bf16.msra.mxu3 %v2009_v21 }
  0xd3   :  { %v853_v29 = vmul.f32 0.01, %v759_v23  ;;  %v734_v32 = vpop.f32.mrf.mxu0  ;;  %v771_v39 = vpop.f32.mrf.mxu3 }
  0xd4   :  { %v772_v0 = vadd.f32 %v771_v39, %v174_v63  ;;  %1249 = vmatpush.bf16.msra.mxu1 %v2002_v18  ;;  %v2006_v32 = vld [vmem:[#allocation4 + $0x48] sm:$0xff] }
  0xd5   :  { %v855_v33 = vmax.f32 %v759_v23, %v853_v29  ;;  %v2008_v23 = vld [vmem:[#allocation4 + $0x58] sm:$0xff] }
  0xd6   :  { %v784_v34 = vpop.f32.mrf.mxu2  ;;  %v747_v40 = vpop.f32.mrf.mxu1  ;;  %1264 = vmatpush.bf16.msra.mxu3 %v2008_v23 }
  0xd7   :  { %v857_v44 = vpack.c.bf16 %v855_v33, %v855_v33  ;;  %v785_v1 = vadd.f32 %v784_v34, %v772_v0  ;;  %v1997_v33 = vld [vmem:[#allocation4] sm:$0xff] }
  0xd8   :  { %1250 = vmatpush.bf16.msra.mxu1 %v2001_v20  ;;  %v2005_v34 = vld [vmem:[#allocation4 + $0x40] sm:$0xff] }
  0xd9   :  { %1065 = vmatmul.bf16.vlgmr.msrb.gmra.mxu1 %v857_v44  ;;  %1091 = vmatmul.bf16.vlgmr.msra.gmra.mxu0 %v857_v44 }
  0xda   :  { %1265 = vmatpush.bf16.msra.mxu3 %v2007_v25 }
  0xdb   :  { %v773_v59 = vpop.f32.mrf.mxu3 }
  0xdc   :  { %1251 = vmatpush.bf16.msra.mxu1 %v2000_v22 }
  0xde   :  { %v786_v54 = vpop.f32.mrf.mxu2  ;;  %1266 = vmatpush.bf16.msra.mxu3 %v2006_v32 }
  0xe0   :  { %1252 = vmatpush.bf16.msra.mxu1 %v1999_v24 }
  0xe2   :  { %1267 = vmatpush.bf16.msra.mxu3 %v2005_v34 }
  0xe4   :  { %1253 = vmatpush.bf16.msra.mxu1 %v1998_v31 }
  0xe8   :  { %1254 = vmatpush.bf16.msra.mxu1 %v1997_v33 }
  0xeb   :  { %v797_v4 = vpop.f32.mrf.mxu0 }
  0xec   :  { %v798_v58 = vadd.f32 %v797_v4, %v785_v1 }
  0xee   :  { %v810_v2 = vpop.f32.mrf.mxu1 }
  0xef   :  { %v811_v51 = vadd.f32 %v810_v2, %v798_v58 }
  0xf3   :  { %v823_v5 = vpop.f32.mrf.mxu3  ;;  %v799_v6 = vpop.f32.mrf.mxu0 }
  0xf4   :  { %v824_v30 = vadd.f32 %v823_v5, %v811_v51 }
  0xf6   :  { %v836_v7 = vpop.f32.mrf.mxu2  ;;  %v812_v8 = vpop.f32.mrf.mxu1 }
  0xf7   :  { %v837_v9 = vadd.f32 %v836_v7, %v824_v30 }
  0xfb   :  { %v825_v3 = vpop.f32.mrf.mxu3  ;;  %v849_v10 = vpop.f32.mrf.mxu0 }
  0xfc   :  { %v850_v37 = vadd.f32 %v849_v10, %v837_v9 }
  0xfe   :  { %v838_v11 = vpop.f32.mrf.mxu2  ;;  %v854_v43 = vmul.f32 0.01, %v850_v37 }
 0x100   :  { %v856_v12 = vmax.f32 %v850_v37, %v854_v43 }
 0x102   :  { %v858_v49 = vpack.c.bf16 %v856_v12, %v856_v12 }
 0x103   :  { %v851_v13 = vpop.f32.mrf.mxu0 }
 0x104   :  { %1078 = vmatmul.bf16.vlgmr.msrb.gmra.mxu3 %v858_v49  ;;  %1104 = vmatmul.bf16.vlgmr.msra.gmra.mxu2 %v858_v49 }
 0x156   :  { %v1066_v26 = vpop.f32.mrf.mxu1  ;;  %v1092_v27 = vpop.f32.mrf.mxu0 }
 0x157   :  { %v1067_v39 = vadd.f32 %v1066_v26, %v893_v36  ;;  %v1093_v40 = vadd.f32 %v1092_v27, %v894_v38 }
 0x15e   :  { %v1068_v28 = vpop.f32.mrf.mxu1  ;;  %v1094_v29 = vpop.f32.mrf.mxu0 }
 0x187   :  { %v1079_v41 = vpop.f32.mrf.mxu3  ;;  %v1105_v42 = vpop.f32.mrf.mxu2 }
 0x188   :  { %v1080_v44 = vadd.f32 %v1079_v41, %v1067_v39  ;;  %v1106_v45 = vadd.f32 %v1105_v42, %v1093_v40 }
 0x18a   :  { %v1109_v46 = vmul.f32 0.01, %v1080_v44  ;;  %v1110_v47 = vmul.f32 0.01, %v1106_v45 }
 0x18c   :  { %v1111_v48 = vmax.f32 %v1080_v44, %v1109_v46  ;;  %v1112_v50 = vmax.f32 %v1106_v45, %v1110_v47 }
 0x18e   :  { %v1113_v52 = vpack.c.bf16 %v1111_v48, %v1111_v48  ;;  %v1114_v53 = vpack.c.bf16 %v1112_v50, %v1112_v50 }
 0x18f   :  { %v1081_v54 = vpop.f32.mrf.mxu3  ;;  %v1107_v55 = vpop.f32.mrf.mxu2 }
 0x190   :  { %1255 = vmatmul.bf16.vlgmr.msra.gmra.mxu1 %v1113_v52  ;;  %1268 = vmatmul.bf16.vlgmr.msra.gmra.mxu3 %v1114_v53 }
 0x20d   :  { %v1256_v56 = vpop.f32.mrf.mxu1 }
 0x20e   :  { %v1257_v59 = vadd.f32 %v2019_v57, %v1256_v56 }
 0x213   :  { %v1269_v60 = vpop.f32.mrf.mxu3 }
 0x214   :  { %v1270_v61 = vadd.f32 %v1269_v60, %v1257_v59 }
 0x215   :  { %v1258_v62 = vpop.f32.mrf.mxu1 }
 0x216   :  { %v1273_v63 = vpack.c.bf16 %v1270_v61, %v1270_v61 }
 0x218   :  { %1274 = vst [vmem:[%s2786_s7] sm:$0xf] %v1273_v63 }
 0x21b   :  { %v1271_v0 = vpop.f32.mrf.mxu3 }
 0x21c   :  { %1279 = vsyncpa [#allocation3], 1 }
 0x21d   :  { %1280 = vsyncpa [#allocation5], 1 }

</bundles_post_ra>
